<compile_context>
chip_gen: v6e
topology: v6e:2x2x1
jax: 0.10.0
libtpu: 0.0.40
codegen_flags: <defaults>
</compile_context>

<pallas_src>
import functools

import jax
import jax.numpy as jnp
from jax.experimental import pallas as pl
from jax.experimental.pallas import tpu as pltpu

# --- hyper-parameters mirrored from scripts/cnn_model.py -------------------
CHANNELS = [1, 5, 12]
KERNEL_SIZE = 30
MAX_POOL = 2
NEURONS = [64, 32]
STRIDE = 15


def _conv_out_len(length, k, s):
    return (length - k) // s + 1


# --------------------------- fused Pallas kernel ----------------------------
def _fused_kernel(pT_ref, w1dT_ref, b1c_ref, w2b_ref, b2f_ref,
                  l1w_ref, l1b_ref, l2w_ref, l2b_ref, l3w_ref, l3b_ref,
                  o_ref, *, c1, f2):
    """Whole forward pass for one batch element (one grid step).

    pT_ref block: (1, 2K, P1) even|odd conv1 patch columns (k index on sublanes,
    pooled position on lanes).  Everything below stays in vregs/VMEM.
    """
    # conv1 (block-diagonal even|odd weight, transposed) + bias + ReLU + MaxPool(2)
    yT = jnp.dot(w1dT_ref[...], pT_ref[0],
                 preferred_element_type=jnp.float32) + b1c_ref[...]      # (2C1, P1)
    # sublanes [:c1] = even conv positions, [c1:] = odd; pool(relu) == relu(max)
    h1T = jnp.maximum(jnp.maximum(yT[:c1, :], yT[c1:, :]), 0.0)          # (C1, P1)

    # conv2 + bias + ReLU + MaxPool(2) + channel-major flatten, decomposed over the
    # C1 input channels; each dot contracts over the 105 pooled positions conv2
    # actually consumes.  Columns of w2b are [even | odd], already ordered as
    # PyTorch's .view(-1, final_dim) (f = c2 * P2 + q), so `flat` IS the MLP input.
    n_used = w2b_ref.shape[1]
    acc = jnp.dot(h1T[0:1, :n_used], w2b_ref[0], preferred_element_type=jnp.float32)
    for c in range(1, c1):
        acc = acc + jnp.dot(h1T[c:c + 1, :n_used], w2b_ref[c],
                            preferred_element_type=jnp.float32)          # (1, 2*F)
    flat = jnp.maximum(jnp.maximum(acc[:, :f2], acc[:, f2:]) + b2f_ref[...], 0.0)

    # MLP head.  TODO(synk): nn.Dropout is identity at inference time; no RNG mask.
    h = jnp.maximum(jnp.dot(flat, l1w_ref[...], preferred_element_type=jnp.float32)
                    + l1b_ref[...], 0.0)
    h = jnp.maximum(jnp.dot(h, l2w_ref[...], preferred_element_type=jnp.float32)
                    + l2b_ref[...], 0.0)
    o_ref[0] = jnp.dot(h, l3w_ref[...], preferred_element_type=jnp.float32) + l3b_ref[...]


# ------------------- one-time (hoisted) weight preprocessing -----------------
def prepare_params(params, dimx):
    """Precompute all derived weights once; NOT part of the per-forward path."""
    (w1, b1, w2, b2, l1w, l1b, l2w, l2b, l3w, l3b) = params
    c0, c1, c2 = CHANNELS
    k, s = KERNEL_SIZE, STRIDE
    # The even/odd pooling trick relies on these; assert so a hyperparameter change
    # fails loudly instead of producing wrong-but-plausible outputs.
    assert k == MAX_POOL * s, "requires kernel_size == max_pool * stride"
    assert c0 == 1, "conv1 patch construction assumes a single input channel"

    p1 = _conv_out_len(dimx, k, s) // MAX_POOL
    p2 = _conv_out_len(p1, k, s) // MAX_POOL
    n_used = (2 * p2 - 1) * s + k            # pooled conv1 positions conv2 consumes
    f2 = c2 * p2                             # final_dim

    # conv1: block-diagonal [[W,0],[0,W]] (transposed) so even & odd share one dot.
    w1m = w1[:, 0, :].astype(jnp.float32)                       # (C1, K)
    w1dT = jnp.zeros((2 * c1, 2 * k), jnp.float32)
    w1dT = w1dT.at[:c1, :k].set(w1m).at[c1:, k:].set(w1m)
    b1c = jnp.concatenate([b1, b1]).reshape(2 * c1, 1).astype(jnp.float32)

    # conv2: per-input-channel expanded weight (C1, n_used, 2*F); columns are
    # [even | odd] and within each half in channel-major order f = c2*P2 + q.
    w2t = jnp.transpose(w2, (1, 2, 0)).astype(jnp.float32)      # (C1, K, C2)
    w2b = jnp.zeros((c1, n_used, 2 * f2), jnp.float32)
    for e in range(2):                       # parity: even / odd conv2 positions
        for q in range(p2):                  # pooled conv2 position
            start = MAX_POOL * s * q + e * s
            w2b = w2b.at[:, start:start + k,
                         e * f2 + q: e * f2 + f2: p2].set(w2t)
    b2f = jnp.repeat(b2, p2).reshape(1, f2).astype(jnp.float32)

    return (w1dT, b1c, w2b, b2f,
            l1w.T.astype(jnp.float32), l1b.reshape(1, -1).astype(jnp.float32),
            l2w.T.astype(jnp.float32), l2b.reshape(1, -1).astype(jnp.float32),
            l3w.T.astype(jnp.float32), l3b.reshape(1, -1).astype(jnp.float32))


# ----------------------------- forward (jitted) ------------------------------
def audio_cnn_forward(x, prepped):
    """x: (B, 1, dimx) float32 (PyTorch NCW).  Returns (B, nlabels) logits."""
    (w1dT, b1c, w2b, b2f, l1wT, l1b, l2wT, l2b, l3wT, l3b) = prepped
    bsz, _, dimx = x.shape
    k, s = KERNEL_SIZE, STRIDE
    c1 = w1dT.shape[0] // 2
    p1 = _conv_out_len(dimx, k, s) // MAX_POOL
    n_used = w2b.shape[1]
    f2 = b2f.shape[1]
    n0, n1, nlabels = l1wT.shape[1], l2wT.shape[1], l3wT.shape[1]

    # conv1 patches, transposed: (B, 2K, P1).  Even/odd receptive fields are
    # contiguous slices because MAX_POOL*STRIDE == KERNEL_SIZE (no gather).
    xs = x[:, 0, :]
    pe = xs[:, :p1 * k].reshape(bsz, p1, k)          # even conv positions
    po = xs[:, s:s + p1 * k].reshape(bsz, p1, k)     # odd conv positions
    pT = jnp.concatenate([pe, po], axis=2).transpose(0, 2, 1)

    cost = pl.CostEstimate(
        flops=2 * bsz * (2 * c1 * 2 * k * p1 + c1 * n_used * 2 * f2
                         + f2 * n0 + n0 * n1 + n1 * nlabels),
        transcendentals=0,
        bytes_accessed=4 * (bsz * 2 * k * p1 + w1dT.size + b1c.size + w2b.size
                            + b2f.size + l1wT.size + l1b.size + l2wT.size
                            + l2b.size + l3wT.size + l3b.size + bsz * nlabels))

    def full(a):
        nd = a.ndim
        return pl.BlockSpec(a.shape, lambda b, _n=nd: (0,) * _n)

    out = pl.pallas_call(
        functools.partial(_fused_kernel, c1=c1, f2=f2),
        grid=(bsz,),
        in_specs=[pl.BlockSpec((1, 2 * k, p1), lambda b: (b, 0, 0)),
                  full(w1dT), full(b1c), full(w2b), full(b2f),
                  full(l1wT), full(l1b), full(l2wT), full(l2b),
                  full(l3wT), full(l3b)],
        out_specs=pl.BlockSpec((1, 1, nlabels), lambda b: (b, 0, 0)),
        out_shape=jax.ShapeDtypeStruct((bsz, 1, nlabels), jnp.float32),
        compiler_params=pltpu.CompilerParams(dimension_semantics=("parallel",)),
        cost_estimate=cost,
    )(pT, w1dT, b1c, w2b, b2f, l1wT, l1b, l2wT, l2b, l3wT, l3b)
    return out.reshape(bsz, nlabels)


# ------------------------ pure-JAX reference check --------------------------
def reference_forward(x, params):
    (w1, b1, w2, b2, l1w, l1b, l2w, l2b, l3w, l3b) = params

    def conv1d(y, w, b):
        dn = jax.lax.conv_dimension_numbers(y.shape, w.shape, ('NCH', 'OIH', 'NCH'))
        y = jax.lax.conv_general_dilated(y, w, window_strides=(STRIDE,),
                                         padding='VALID', dimension_numbers=dn)
        return y + b[None, :, None]

    def pool(y):
        p = y.shape[-1] // MAX_POOL
        return y[..., :p * MAX_POOL].reshape(y.shape[0], y.shape[1], p, MAX_POOL).max(-1)

    y = pool(jnp.maximum(conv1d(x, w1, b1), 0.0))
    y = pool(jnp.maximum(conv1d(y, w2, b2), 0.0))
    y = y.reshape(y.shape[0], -1)
    y = jnp.maximum(jnp.dot(y, l1w.T) + l1b, 0.0)
    y = jnp.maximum(jnp.dot(y, l2w.T) + l2b, 0.0)
    return jnp.dot(y, l3w.T) + l3b


# ---------------------------------- main -------------------------------------
if __name__ == "__main__":
    B, NLABELS, DIMX = 2, 10, 4000  # kernel_size=30 / stride=15 force a longish sequence

    # actual pooled lengths -> final_dim; must agree with the module's formula
    L1 = _conv_out_len(DIMX, KERNEL_SIZE, STRIDE)
    P1 = L1 // MAX_POOL
    L2 = _conv_out_len(P1, KERNEL_SIZE, STRIDE)
    P2 = L2 // MAX_POOL
    final_dim = CHANNELS[2] * P2
    final_dim_module = CHANNELS[2] * int(
        (int((DIMX - (KERNEL_SIZE - 1)) / STRIDE / MAX_POOL) - (KERNEL_SIZE - 1))
        / STRIDE / MAX_POOL)
    assert final_dim == final_dim_module, (final_dim, final_dim_module)

    key = jax.random.PRNGKey(0)
    ks = jax.random.split(key, 11)

    def init(kk, shape, fan_in):
        return jax.random.normal(kk, shape, jnp.float32) / jnp.sqrt(float(fan_in))

    params = (
        init(ks[0], (CHANNELS[1], CHANNELS[0], KERNEL_SIZE), CHANNELS[0] * KERNEL_SIZE),
        init(ks[1], (CHANNELS[1],), CHANNELS[0] * KERNEL_SIZE),
        init(ks[2], (CHANNELS[2], CHANNELS[1], KERNEL_SIZE), CHANNELS[1] * KERNEL_SIZE),
        init(ks[3], (CHANNELS[2],), CHANNELS[1] * KERNEL_SIZE),
        init(ks[4], (NEURONS[0], final_dim), final_dim),
        init(ks[5], (NEURONS[0],), final_dim),
        init(ks[6], (NEURONS[1], NEURONS[0]), NEURONS[0]),
        init(ks[7], (NEURONS[1],), NEURONS[0]),
        init(ks[8], (NLABELS, NEURONS[1]), NEURONS[1]),
        init(ks[9], (NLABELS,), NEURONS[1]),
    )
    x = jax.random.normal(ks[10], (B, CHANNELS[0], DIMX), jnp.float32)

    prepped = prepare_params(params, DIMX)        # one-time weight preprocessing
    fwd = jax.jit(audio_cnn_forward)
    out = jax.block_until_ready(fwd(x, prepped))
    ref = jax.block_until_ready(reference_forward(x, params))
    assert out.shape == (B, NLABELS), out.shape
    assert jnp.allclose(out, ref, atol=5e-2, rtol=5e-2), float(jnp.max(jnp.abs(out - ref)))
    print("KERNEL_OK")
</pallas_src>

<mosaic_0001>
module attributes {stable_mosaic.version = 11 : i64} {
  func.func @_fused_kernel(%arg0: i32, %arg1: memref<1x60x132xf32, #tpu.memory_space<vmem>>, %arg2: memref<10x60xf32, #tpu.memory_space<vmem>>, %arg3: memref<10x1xf32, #tpu.memory_space<vmem>>, %arg4: memref<5x105x72xf32, #tpu.memory_space<vmem>>, %arg5: memref<1x36xf32, #tpu.memory_space<vmem>>, %arg6: memref<36x64xf32, #tpu.memory_space<vmem>>, %arg7: memref<1x64xf32, #tpu.memory_space<vmem>>, %arg8: memref<64x32xf32, #tpu.memory_space<vmem>>, %arg9: memref<1x32xf32, #tpu.memory_space<vmem>>, %arg10: memref<32x10xf32, #tpu.memory_space<vmem>>, %arg11: memref<1x10xf32, #tpu.memory_space<vmem>>, %arg12: memref<1x1x10xf32, #tpu.memory_space<vmem>>) attributes {dimension_semantics = [#tpu.dimension_semantics<parallel>], iteration_bounds = array<i64: 2>, scalar_prefetch = 0 : i64, scratch_operands = 0 : i64, tpu.core_type = #tpu.core_type<tc>, window_params = [{transform_indices = @transform_0, window_bounds = array<i64: 1, 60, 132>}, {pipeline_mode = #tpu.pipeline_mode<synchronous>, transform_indices = @transform_1, window_bounds = array<i64: 10, 60>}, {pipeline_mode = #tpu.pipeline_mode<synchronous>, transform_indices = @transform_2, window_bounds = array<i64: 10, 1>}, {pipeline_mode = #tpu.pipeline_mode<synchronous>, transform_indices = @transform_3, window_bounds = array<i64: 5, 105, 72>}, {pipeline_mode = #tpu.pipeline_mode<synchronous>, transform_indices = @transform_4, window_bounds = array<i64: 1, 36>}, {pipeline_mode = #tpu.pipeline_mode<synchronous>, transform_indices = @transform_5, window_bounds = array<i64: 36, 64>}, {pipeline_mode = #tpu.pipeline_mode<synchronous>, transform_indices = @transform_6, window_bounds = array<i64: 1, 64>}, {pipeline_mode = #tpu.pipeline_mode<synchronous>, transform_indices = @transform_7, window_bounds = array<i64: 64, 32>}, {pipeline_mode = #tpu.pipeline_mode<synchronous>, transform_indices = @transform_8, window_bounds = array<i64: 1, 32>}, {pipeline_mode = #tpu.pipeline_mode<synchronous>, transform_indices = @transform_9, window_bounds = array<i64: 32, 10>}, {pipeline_mode = #tpu.pipeline_mode<synchronous>, transform_indices = @transform_10, window_bounds = array<i64: 1, 10>}, {transform_indices = @transform_11, window_bounds = array<i64: 1, 1, 10>}]} {
    %c0 = arith.constant 0 : index
    %c0_0 = arith.constant 0 : index
    %0 = vector.load %arg2[%c0, %c0_0] : memref<10x60xf32, #tpu.memory_space<vmem>>, vector<10x60xf32>
    %c0_1 = arith.constant 0 : index
    %c0_2 = arith.constant 0 : index
    %c0_3 = arith.constant 0 : index
    %1 = vector.load %arg1[%c0_1, %c0_2, %c0_3] : memref<1x60x132xf32, #tpu.memory_space<vmem>>, vector<1x60x132xf32>
    %2 = vector.shape_cast %1 : vector<1x60x132xf32> to vector<60x132xf32>
    %cst = arith.constant dense<0.000000e+00> : vector<10x132xf32>
    %3 = tpu.matmul %0, %2, %cst {dimension_numbers = #tpu.dot_dimension_numbers<[1], [0], [0], [1], [0, 0, 1, 1], [], []>} : vector<10x60xf32>, vector<60x132xf32>, vector<10x132xf32> -> vector<10x132xf32>
    %c0_4 = arith.constant 0 : index
    %c0_5 = arith.constant 0 : index
    %4 = vector.load %arg3[%c0_4, %c0_5] : memref<10x1xf32, #tpu.memory_space<vmem>>, vector<10x1xf32>
    %5 = vector.broadcast %4 : vector<10x1xf32> to vector<10x132xf32>
    %6 = arith.addf %3, %5 : vector<10x132xf32>
    %7 = vector.extract_strided_slice %6 {offsets = [0, 0], sizes = [5, 132], strides = [1, 1]} : vector<10x132xf32> to vector<5x132xf32>
    %8 = vector.extract_strided_slice %6 {offsets = [5, 0], sizes = [5, 132], strides = [1, 1]} : vector<10x132xf32> to vector<5x132xf32>
    %9 = arith.maximumf %7, %8 : vector<5x132xf32>
    %cst_6 = arith.constant 0.000000e+00 : f32
    %10 = vector.broadcast %cst_6 : f32 to vector<5x132xf32>
    %11 = arith.maximumf %9, %10 : vector<5x132xf32>
    %12 = vector.extract_strided_slice %11 {offsets = [0, 0], sizes = [1, 105], strides = [1, 1]} : vector<5x132xf32> to vector<1x105xf32>
    %c0_7 = arith.constant 0 : index
    %c0_8 = arith.constant 0 : index
    %c0_9 = arith.constant 0 : index
    %13 = vector.load %arg4[%c0_7, %c0_8, %c0_9] : memref<5x105x72xf32, #tpu.memory_space<vmem>>, vector<1x105x72xf32>
    %14 = vector.shape_cast %13 : vector<1x105x72xf32> to vector<105x72xf32>
    %cst_10 = arith.constant dense<0.000000e+00> : vector<1x72xf32>
    %15 = tpu.matmul %12, %14, %cst_10 {dimension_numbers = #tpu.dot_dimension_numbers<[1], [0], [0], [1], [0, 0, 1, 1], [], []>} : vector<1x105xf32>, vector<105x72xf32>, vector<1x72xf32> -> vector<1x72xf32>
    %16 = vector.extract_strided_slice %11 {offsets = [1, 0], sizes = [1, 105], strides = [1, 1]} : vector<5x132xf32> to vector<1x105xf32>
    %c1 = arith.constant 1 : index
    %c0_11 = arith.constant 0 : index
    %c0_12 = arith.constant 0 : index
    %17 = vector.load %arg4[%c1, %c0_11, %c0_12] : memref<5x105x72xf32, #tpu.memory_space<vmem>>, vector<1x105x72xf32>
    %18 = vector.shape_cast %17 : vector<1x105x72xf32> to vector<105x72xf32>
    %cst_13 = arith.constant dense<0.000000e+00> : vector<1x72xf32>
    %19 = tpu.matmul %16, %18, %cst_13 {dimension_numbers = #tpu.dot_dimension_numbers<[1], [0], [0], [1], [0, 0, 1, 1], [], []>} : vector<1x105xf32>, vector<105x72xf32>, vector<1x72xf32> -> vector<1x72xf32>
    %20 = arith.addf %15, %19 : vector<1x72xf32>
    %21 = vector.extract_strided_slice %11 {offsets = [2, 0], sizes = [1, 105], strides = [1, 1]} : vector<5x132xf32> to vector<1x105xf32>
    %c2 = arith.constant 2 : index
    %c0_14 = arith.constant 0 : index
    %c0_15 = arith.constant 0 : index
    %22 = vector.load %arg4[%c2, %c0_14, %c0_15] : memref<5x105x72xf32, #tpu.memory_space<vmem>>, vector<1x105x72xf32>
    %23 = vector.shape_cast %22 : vector<1x105x72xf32> to vector<105x72xf32>
    %cst_16 = arith.constant dense<0.000000e+00> : vector<1x72xf32>
    %24 = tpu.matmul %21, %23, %cst_16 {dimension_numbers = #tpu.dot_dimension_numbers<[1], [0], [0], [1], [0, 0, 1, 1], [], []>} : vector<1x105xf32>, vector<105x72xf32>, vector<1x72xf32> -> vector<1x72xf32>
    %25 = arith.addf %20, %24 : vector<1x72xf32>
    %26 = vector.extract_strided_slice %11 {offsets = [3, 0], sizes = [1, 105], strides = [1, 1]} : vector<5x132xf32> to vector<1x105xf32>
    %c3 = arith.constant 3 : index
    %c0_17 = arith.constant 0 : index
    %c0_18 = arith.constant 0 : index
    %27 = vector.load %arg4[%c3, %c0_17, %c0_18] : memref<5x105x72xf32, #tpu.memory_space<vmem>>, vector<1x105x72xf32>
    %28 = vector.shape_cast %27 : vector<1x105x72xf32> to vector<105x72xf32>
    %cst_19 = arith.constant dense<0.000000e+00> : vector<1x72xf32>
    %29 = tpu.matmul %26, %28, %cst_19 {dimension_numbers = #tpu.dot_dimension_numbers<[1], [0], [0], [1], [0, 0, 1, 1], [], []>} : vector<1x105xf32>, vector<105x72xf32>, vector<1x72xf32> -> vector<1x72xf32>
    %30 = arith.addf %25, %29 : vector<1x72xf32>
    %31 = vector.extract_strided_slice %11 {offsets = [4, 0], sizes = [1, 105], strides = [1, 1]} : vector<5x132xf32> to vector<1x105xf32>
    %c4 = arith.constant 4 : index
    %c0_20 = arith.constant 0 : index
    %c0_21 = arith.constant 0 : index
    %32 = vector.load %arg4[%c4, %c0_20, %c0_21] : memref<5x105x72xf32, #tpu.memory_space<vmem>>, vector<1x105x72xf32>
    %33 = vector.shape_cast %32 : vector<1x105x72xf32> to vector<105x72xf32>
    %cst_22 = arith.constant dense<0.000000e+00> : vector<1x72xf32>
    %34 = tpu.matmul %31, %33, %cst_22 {dimension_numbers = #tpu.dot_dimension_numbers<[1], [0], [0], [1], [0, 0, 1, 1], [], []>} : vector<1x105xf32>, vector<105x72xf32>, vector<1x72xf32> -> vector<1x72xf32>
    %35 = arith.addf %30, %34 : vector<1x72xf32>
    %36 = vector.extract_strided_slice %35 {offsets = [0, 0], sizes = [1, 36], strides = [1, 1]} : vector<1x72xf32> to vector<1x36xf32>
    %37 = vector.extract_strided_slice %35 {offsets = [0, 36], sizes = [1, 36], strides = [1, 1]} : vector<1x72xf32> to vector<1x36xf32>
    %38 = arith.maximumf %36, %37 : vector<1x36xf32>
    %c0_23 = arith.constant 0 : index
    %c0_24 = arith.constant 0 : index
    %39 = vector.load %arg5[%c0_23, %c0_24] : memref<1x36xf32, #tpu.memory_space<vmem>>, vector<1x36xf32>
    %40 = arith.addf %38, %39 : vector<1x36xf32>
    %cst_25 = arith.constant 0.000000e+00 : f32
    %41 = vector.broadcast %cst_25 : f32 to vector<1x36xf32>
    %42 = arith.maximumf %40, %41 : vector<1x36xf32>
    %c0_26 = arith.constant 0 : index
    %c0_27 = arith.constant 0 : index
    %43 = vector.load %arg6[%c0_26, %c0_27] : memref<36x64xf32, #tpu.memory_space<vmem>>, vector<36x64xf32>
    %cst_28 = arith.constant dense<0.000000e+00> : vector<1x64xf32>
    %44 = tpu.matmul %42, %43, %cst_28 {dimension_numbers = #tpu.dot_dimension_numbers<[1], [0], [0], [1], [0, 0, 1, 1], [], []>} : vector<1x36xf32>, vector<36x64xf32>, vector<1x64xf32> -> vector<1x64xf32>
    %c0_29 = arith.constant 0 : index
    %c0_30 = arith.constant 0 : index
    %45 = vector.load %arg7[%c0_29, %c0_30] : memref<1x64xf32, #tpu.memory_space<vmem>>, vector<1x64xf32>
    %46 = arith.addf %44, %45 : vector<1x64xf32>
    %cst_31 = arith.constant 0.000000e+00 : f32
    %47 = vector.broadcast %cst_31 : f32 to vector<1x64xf32>
    %48 = arith.maximumf %46, %47 : vector<1x64xf32>
    %c0_32 = arith.constant 0 : index
    %c0_33 = arith.constant 0 : index
    %49 = vector.load %arg8[%c0_32, %c0_33] : memref<64x32xf32, #tpu.memory_space<vmem>>, vector<64x32xf32>
    %cst_34 = arith.constant dense<0.000000e+00> : vector<1x32xf32>
    %50 = tpu.matmul %48, %49, %cst_34 {dimension_numbers = #tpu.dot_dimension_numbers<[1], [0], [0], [1], [0, 0, 1, 1], [], []>} : vector<1x64xf32>, vector<64x32xf32>, vector<1x32xf32> -> vector<1x32xf32>
    %c0_35 = arith.constant 0 : index
    %c0_36 = arith.constant 0 : index
    %51 = vector.load %arg9[%c0_35, %c0_36] : memref<1x32xf32, #tpu.memory_space<vmem>>, vector<1x32xf32>
    %52 = arith.addf %50, %51 : vector<1x32xf32>
    %cst_37 = arith.constant 0.000000e+00 : f32
    %53 = vector.broadcast %cst_37 : f32 to vector<1x32xf32>
    %54 = arith.maximumf %52, %53 : vector<1x32xf32>
    %c0_38 = arith.constant 0 : index
    %c0_39 = arith.constant 0 : index
    %55 = vector.load %arg10[%c0_38, %c0_39] : memref<32x10xf32, #tpu.memory_space<vmem>>, vector<32x10xf32>
    %cst_40 = arith.constant dense<0.000000e+00> : vector<1x10xf32>
    %56 = tpu.matmul %54, %55, %cst_40 {dimension_numbers = #tpu.dot_dimension_numbers<[1], [0], [0], [1], [0, 0, 1, 1], [], []>} : vector<1x32xf32>, vector<32x10xf32>, vector<1x10xf32> -> vector<1x10xf32>
    %c0_41 = arith.constant 0 : index
    %c0_42 = arith.constant 0 : index
    %57 = vector.load %arg11[%c0_41, %c0_42] : memref<1x10xf32, #tpu.memory_space<vmem>>, vector<1x10xf32>
    %58 = arith.addf %56, %57 : vector<1x10xf32>
    %c0_43 = arith.constant 0 : index
    %c0_44 = arith.constant 0 : index
    %c0_45 = arith.constant 0 : index
    %59 = vector.load %arg12[%c0_43, %c0_44, %c0_45] : memref<1x1x10xf32, #tpu.memory_space<vmem>>, vector<1x1x10xf32>
    %60 = vector.shape_cast %59 : vector<1x1x10xf32> to vector<1x10xf32>
    %61 = vector.shape_cast %58 : vector<1x10xf32> to vector<1x1x10xf32>
    tpu.vector_store %arg12[%c0_43, %c0_44, %c0_45], %61 {strides = array<i32>} : memref<1x1x10xf32, #tpu.memory_space<vmem>>, vector<1x1x10xf32>,
    return
  }
  func.func @transform_0(%arg0: i32) -> (i32, i32, i32) {
    %c0_i32 = arith.constant 0 : i32
    %c0_i32_0 = arith.constant 0 : i32
    %c0_i32_1 = arith.constant 0 : i32
    return %arg0, %c0_i32, %c0_i32_0 : i32, i32, i32
  }
  func.func @transform_1(%arg0: i32) -> (i32, i32) {
    %c0_i32 = arith.constant 0 : i32
    %c0_i32_0 = arith.constant 0 : i32
    %c0_i32_1 = arith.constant 0 : i32
    return %c0_i32, %c0_i32_0 : i32, i32
  }
  func.func @transform_2(%arg0: i32) -> (i32, i32) {
    %c0_i32 = arith.constant 0 : i32
    %c0_i32_0 = arith.constant 0 : i32
    %c0_i32_1 = arith.constant 0 : i32
    return %c0_i32, %c0_i32_0 : i32, i32
  }
  func.func @transform_3(%arg0: i32) -> (i32, i32, i32) {
    %c0_i32 = arith.constant 0 : i32
    %c0_i32_0 = arith.constant 0 : i32
    %c0_i32_1 = arith.constant 0 : i32
    %c0_i32_2 = arith.constant 0 : i32
    return %c0_i32, %c0_i32_0, %c0_i32_1 : i32, i32, i32
  }
  func.func @transform_4(%arg0: i32) -> (i32, i32) {
    %c0_i32 = arith.constant 0 : i32
    %c0_i32_0 = arith.constant 0 : i32
    %c0_i32_1 = arith.constant 0 : i32
    return %c0_i32, %c0_i32_0 : i32, i32
  }
  func.func @transform_5(%arg0: i32) -> (i32, i32) {
    %c0_i32 = arith.constant 0 : i32
    %c0_i32_0 = arith.constant 0 : i32
    %c0_i32_1 = arith.constant 0 : i32
    return %c0_i32, %c0_i32_0 : i32, i32
  }
  func.func @transform_6(%arg0: i32) -> (i32, i32) {
    %c0_i32 = arith.constant 0 : i32
    %c0_i32_0 = arith.constant 0 : i32
    %c0_i32_1 = arith.constant 0 : i32
    return %c0_i32, %c0_i32_0 : i32, i32
  }
  func.func @transform_7(%arg0: i32) -> (i32, i32) {
    %c0_i32 = arith.constant 0 : i32
    %c0_i32_0 = arith.constant 0 : i32
    %c0_i32_1 = arith.constant 0 : i32
    return %c0_i32, %c0_i32_0 : i32, i32
  }
  func.func @transform_8(%arg0: i32) -> (i32, i32) {
    %c0_i32 = arith.constant 0 : i32
    %c0_i32_0 = arith.constant 0 : i32
    %c0_i32_1 = arith.constant 0 : i32
    return %c0_i32, %c0_i32_0 : i32, i32
  }
  func.func @transform_9(%arg0: i32) -> (i32, i32) {
    %c0_i32 = arith.constant 0 : i32
    %c0_i32_0 = arith.constant 0 : i32
    %c0_i32_1 = arith.constant 0 : i32
    return %c0_i32, %c0_i32_0 : i32, i32
  }
  func.func @transform_10(%arg0: i32) -> (i32, i32) {
    %c0_i32 = arith.constant 0 : i32
    %c0_i32_0 = arith.constant 0 : i32
    %c0_i32_1 = arith.constant 0 : i32
    return %c0_i32, %c0_i32_0 : i32, i32
  }
  func.func @transform_11(%arg0: i32) -> (i32, i32, i32) {
    %c0_i32 = arith.constant 0 : i32
    %c0_i32_0 = arith.constant 0 : i32
    %c0_i32_1 = arith.constant 0 : i32
    return %arg0, %c0_i32, %c0_i32_0 : i32, i32, i32
  }
}

</mosaic_0001>

<bundles_post_ra>
// kernel: audio_cnn_forward.1
= control target key start
LH: loop header
LB: loop body
LE: loop exit
PB: predicated region body
PF: predicated region fallthrough
CT: control target
= control target key end

     0   :  { %16 = vsyncpa [#allocation3], 0  ;;  %s2365_s0 = inlined_call_operand.vmem [shape: f32[2,60,132], index: 0, kind: input, shape index: {}]   ;;  %s2366_s1 = inlined_call_operand.vmem [shape: f32[10,60], index: 1, kind: input, shape index: {}]   ;;  %s2367_s2 = inlined_call_operand.vmem [shape: f32[10,1], index: 2, kind: input, shape index: {}]   ;;  %s2368_s3 = inlined_call_operand.vmem [shape: f32[5,105,72], index: 3, kind: input, shape index: {}]   ;;  %s2369_s4 = inlined_call_operand.vmem [shape: f32[1,36], index: 4, kind: input, shape index: {}]   ;;  %s2370_s5 = inlined_call_operand.vmem [shape: f32[36,64], index: 5, kind: input, shape index: {}]   ;;  %s2371_s6 = inlined_call_operand.vmem [shape: f32[1,64], index: 6, kind: input, shape index: {}]   ;;  %s2372_s7 = inlined_call_operand.vmem [shape: f32[64,32], index: 7, kind: input, shape index: {}]   ;;  %s2373_s8 = inlined_call_operand.vmem [shape: f32[1,32], index: 8, kind: input, shape index: {}]   ;;  %s2374_s9 = inlined_call_operand.vmem [shape: f32[32,10], index: 9, kind: input, shape index: {}]   ;;  %s2375_s10 = inlined_call_operand.vmem [shape: f32[1,10], index: 10, kind: input, shape index: {}]   ;;  %s2376_s11 = inlined_call_operand.hbm [shape: f32[2,1,10], index: 11, kind: output, shape index: {}]  }
   0x1   :  { %18 = vsyncpa [#allocation3 + $0x1], 0  ;;  %s1844_s17 = smov 0   ;;  %s1846_s18 = smov 0  }
   0x2   :  { %s1848_s19 = smov 0   ;;  %s1850_s20 = smov 0  }
   0x3 LB: > { %s1865_s21 = sadd.s32 4294967295, %s1777_s20   ;;  %s1296_s22 = sadd.s32 4294967294, %s1777_s20   ;;  %s1777_s20 = sphi %s1850_s20, %s2384_s20   ;;  %s1773_s19 = sphi %s1848_s19, %s2383_s19   ;;  %s1769_s18 = sphi %s1846_s18, %s2382_s18   ;;  %s1765_s17 = sphi %s1844_s17, %s2381_s17  }
   0x4   : > { %s1869_s23 = sadd.s32 1, %s1777_s20   ;;  %s267_s24 = sadd.s32 1, %s1773_s19 }
   0x5   : > { %s264_s25 = ssub.s32 %s1777_s20, %s1869_s23  ;;  %p277_p0 = scmp.ne.s32.totalorder %s1773_s19, %s1769_s18 }
   0x6   : > { %p265_p1 = scmp.eq.s32.totalorder %s264_s25, 0  ;;  %p278_p2 = scmp.eq.s32.totalorder %s1865_s21, 1 }
   0x7   : > { %p283_p3 = scmp.ne.s32.totalorder %s1769_s18, %s1765_s17  ;;  %p284_p4 = scmp.eq.s32.totalorder %s1296_s22, 1 }
   0x8   : > { %s1880_s26 = scalar_select %p265_p1, %s1773_s19, %s267_s24  }
   0x9   : > { %p1882_p5 = por %p278_p2, %p277_p0  ;;  %p1886_p6 = por %p284_p4, %p283_p3 }
   0xa   : > { %2377 = sst [smem:[#allocation5_spill]] %s1880_s26  ;;  %p1299_p7 = scmp.ge.s32.totalorder %s1777_s20, 1 }
   0xb   : > { %p340_p8 = scmp.lt.s32.totalorder %s1777_s20, 3 }
   0xd   : > { %p341_p9 = pnand %p1299_p7, %p340_p8 }
   0xe   : > { %p379_p10 = scmp.lt.s32.totalorder (!%p341_p9), %s1865_s21, 1  ;;  %s1376_s29 = sshll.u32 (!%p341_p9), %s1865_s21, 4 }
   0xf   : > { %344 = sbr.rel (%p341_p9) target bundleno = 1224 (0x4c8), region = 64  ;;  %s2330_s15 = scalar_lea.hbm (!%p341_p9), %s2376_s11, %s1376_s29 }
  0x14   : > { %v1779_v0 = vmov 0.0   ;;  %v1780_v1 = vmov 0   ;;  %v402_v2 = vld [vmem:[%s2367_s2] sm:$0xff]  ;;  %s380_s12 = scalar_select %p379_p10, %s1865_s21, 1  ;;  %vm546_vm0 = vcmask 1040384   ;;  %v1318_v5 = vld [vmem:[%s2368_s3 + $0xd0] sm:$0xff] }
  0x15   : > { %492 = vmatprep.mubr.f32.mxu0 %v1779_v0  ;;  %1716 = vset.pattern.permute.xlu0 %v1780_v1  ;;  %v1319_v3 = vld [vmem:[%s2368_s3 + $0xd8] sm:$0x1]  ;;  %v403_v4 = vld [vmem:[%s2367_s2 + $0x8] sm:$0x3]  ;;  %vm421_vm1 = vcmask 1043456   ;;  %v1316_v7 = vld [vmem:[%s2368_s3 + $0xc0] sm:$0xff] }
  0x16   : > { %406 = vperm.xlu0 %1716, %v402_v2   ;;  %1475 = vmatprep.subr.mxu1 %v1779_v0  ;;  %s1379_s25 = sshll.u32 %s380_s12, 7  ;;  %v1317_v6 = vld [vmem:[%s2368_s3 + $0xc8] sm:$0xff]  ;;  %v1315_v13 = vld [vmem:[%s2368_s3 + $0xb8] sm:$0xff]  ;;  %v1314_v16 = vld [vmem:[%s2368_s3 + $0xb0] sm:$0xff]  ;;  %vm414_vm2 = vcmask 490496   ;;  %vm1781_vm3 = vmmov 0  }
  0x17   : > { %1476 = vmatpush3.msk.msra.mxu1 %vm546_vm0, %v1319_v3  ;;  %s1916_s26 = scalar_lea.vmem %s2365_s0, %s1379_s25  ;;  %v1313_v19 = vld [vmem:[%s2368_s3 + $0xa8] sm:$0xff]  ;;  %v384_v27 = vld [vmem:[%s2366_s1] sm:$0xff]  ;;  %v523_v31 = vld [vmem:[%s2368_s3 + $0x58] sm:$0xff]  ;;  %1503 = vmatprep.mubr.msk.f32.mxu1 %vm1781_vm3, %v1779_v0  ;;  %vm505_vm4 = vcmask 1042432   ;;  %vm543_vm5 = vcmask 859136   ;;  %s1782_s25 = smov 92  }
  0x18   : > { %1477 = vmatprep.subr.mxu1 %v1779_v0  ;;  %v401_v8 = vld [vmem:[%s1916_s26 + $0x78] sm:$0xf]  ;;  %v400_v9 = vld [vmem:[%s1916_s26 + $0x70] sm:$0xf]  ;;  %v399_v10 = vld [vmem:[%s1916_s26 + $0x68] sm:$0xff]  ;;  %vm985_vm6 = vcmask 293888  }
  0x19   : > { %1478 = vmatpush3.msra.mxu1 %v1318_v5  ;;  %1302 = vmatprep.subr.msk.mxu0 %vm421_vm1, %v401_v8  ;;  %v398_v11 = vld [vmem:[%s1916_s26 + $0x60] sm:$0xff]  ;;  %v397_v12 = vld [vmem:[%s1916_s26 + $0x58] sm:$0xff]  ;;  %v396_v14 = vld [vmem:[%s1916_s26 + $0x50] sm:$0xff]  ;;  %vm1072_vm7 = vcmask 523264   ;;  %vm1152_vm8 = vcmask 261120   ;;  %vm1226_vm9 = vcmask 73728  }
  0x1a   : > { %411 = vperm.xlu0 %1716, %v403_v4   ;;  %1479 = vmatprep.subr.mxu1 %v1779_v0  ;;  %v395_v15 = vld [vmem:[%s1916_s26 + $0x48] sm:$0xff]  ;;  %v394_v17 = vld [vmem:[%s1916_s26 + $0x40] sm:$0xff]  ;;  %v393_v18 = vld [vmem:[%s1916_s26 + $0x38] sm:$0xff]  ;;  %s1783_s21 = smov [#allocation2]  }
  0x1b   : > { %1480 = vmatpush3.msra.mxu1 %v1317_v6  ;;  %1303 = vmatpush1.msk.msra.mxu0 %vm421_vm1, %v400_v9  ;;  %v392_v20 = vld [vmem:[%s1916_s26 + $0x30] sm:$0xff]  ;;  %v391_v21 = vld [vmem:[%s1916_s26 + $0x28] sm:$0xff]  ;;  %v390_v22 = vld [vmem:[%s1916_s26 + $0x20] sm:$0xff]  ;;  %s1721_s24 = sshll.u32 %s1783_s21, 4  ;;  %s1722_s24 = int_to_ptr.vmem [resolvable:$false] %s1721_s24 }
  0x1c   : > { %1481 = vmatprep.subr.mxu1 %v1779_v0  ;;  %446 = vmatprep.subr.mxu0 %v399_v10  ;;  %v389_v23 = vld [vmem:[%s1916_s26 + $0x18] sm:$0xff]  ;;  %v388_v24 = vld [vmem:[%s1916_s26 + $0x10] sm:$0xff]  ;;  %v387_v25 = vld [vmem:[%s1916_s26 + $0x8] sm:$0xff] }
  0x1d   : > { %1482 = vmatpush3.msra.mxu1 %v1316_v7  ;;  %447 = vmatpush1.msra.mxu0 %v398_v11  ;;  %v386_v26 = vld [vmem:[%s1916_s26] sm:$0xff]  ;;  %v525_v28 = vld [vmem:[%s2368_s3 + $0x68] sm:$0x1]  ;;  %v522_v32 = vld [vmem:[%s2368_s3 + $0x50] sm:$0xff]  ;;  %s377_s26 = sand.u32 1, %s1769_s18  }
  0x1e   : > { %1483 = vmatprep.subr.mxu1 %v1779_v0  ;;  %448 = vmatprep.subr.mxu0 %v397_v12  ;;  %v524_v29 = vld [vmem:[%s2368_s3 + $0x60] sm:$0xff]  ;;  %v385_v30 = vld [vmem:[%s2366_s1 + $0x8] sm:$0x3]  ;;  %v519_v35 = vld [vmem:[%s2368_s3 + $0x38] sm:$0xff]  ;;  %s378_s30 = scalar_lea.vmem [#allocation2], %s377_s26  ;;  %s1229_s16 = scalar_lea.sflag [#allocation3], %s377_s26 }
  0x1f   : > { %1484 = vmatpush3.msra.mxu1 %v1315_v13  ;;  %449 = vmatpush1.msra.mxu0 %v396_v14  ;;  %v521_v33 = vld [vmem:[%s2368_s3 + $0x48] sm:$0xff]  ;;  %v520_v34 = vld [vmem:[%s2368_s3 + $0x40] sm:$0xff]  ;;  %v518_v36 = vld [vmem:[%s2368_s3 + $0x30] sm:$0xff]  ;;  %s1241_s13 = sshll.u32 %s378_s30, 4  ;;  %s1242_s13 = int_to_ptr.vmem [resolvable:$true] %s1241_s13 }
  0x20   : > { %1485 = vmatprep.subr.mxu1 %v1779_v0  ;;  %450 = vmatprep.subr.mxu0 %v395_v15  ;;  %v1312_v37 = vld [vmem:[%s2368_s3 + $0xa0] sm:$0xff]  ;;  %v517_v38 = vld [vmem:[%s2368_s3 + $0x28] sm:$0xff]  ;;  %v1311_v39 = vld [vmem:[%s2368_s3 + $0x98] sm:$0xff]  ;;  %s1717_s22 = scalar_lea.vmem %s1242_s13, 16  ;;  %p1724_p0 = scmp.lt.s32.totalorder %s1242_s13, %s1722_s24 }
  0x21   : > { %1486 = vmatpush3.msra.mxu1 %v1314_v16  ;;  %451 = vmatpush1.msra.mxu0 %v394_v17  ;;  %v516_v40 = vld [vmem:[%s2368_s3 + $0x20] sm:$0xff]  ;;  %v1310_v41 = vld [vmem:[%s2368_s3 + $0x90] sm:$0xff]  ;;  %v515_v42 = vld [vmem:[%s2368_s3 + $0x18] sm:$0xff]  ;;  %p1718_p11 = scmp.ne.s32.totalorder %s1242_s13, %s1717_s22 }
  0x22   : > { %1487 = vmatprep.subr.mxu1 %v1779_v0  ;;  %452 = vmatprep.subr.mxu0 %v393_v18  ;;  %v1309_v43 = vld [vmem:[%s2368_s3 + $0x88] sm:$0xff]  ;;  %v514_v44 = vld [vmem:[%s2368_s3 + $0x10] sm:$0xff]  ;;  %v1308_v45 = vld [vmem:[%s2368_s3 + $0x80] sm:$0xff] }
  0x23   : > { %1488 = vmatpush3.msra.mxu1 %v1313_v19  ;;  %453 = vmatpush1.msra.mxu0 %v392_v20  ;;  %v513_v46 = vld [vmem:[%s2368_s3 + $0x8] sm:$0xff]  ;;  %v1307_v47 = vld [vmem:[%s2368_s3 + $0x78] sm:$0xff]  ;;  %v512_v48 = vld [vmem:[%s2368_s3] sm:$0xff]  ;;  %p1719_p12 = pnand %p1718_p11, %p1882_p5 }
  0x24   : > { %1489 = vmatprep.subr.mxu1 %v1779_v0  ;;  %454 = vmatprep.subr.mxu0 %v391_v21  ;;  %v1306_v49 = vld [vmem:[%s2368_s3 + $0x70] sm:$0xff]  ;;  %v1353_v63 = vld [vmem:[%s2368_s3 + $0x1b8] sm:$0x1]  ;;  %v1337_v2 = vld [vmem:[%s2368_s3 + $0x148] sm:$0x1] }
  0x25   : > { %455 = vmatpush1.msra.mxu0 %v390_v22  ;;  %1490 = vmatpush3.msra.mxu1 %v1312_v37  ;;  %v1352_v3 = vld [vmem:[%s2368_s3 + $0x1b0] sm:$0xff]  ;;  %v1336_v4 = vld [vmem:[%s2368_s3 + $0x140] sm:$0xff]  ;;  %v1351_v5 = vld [vmem:[%s2368_s3 + $0x1a8] sm:$0xff]  ;;  %p1720_p13 = pneg %p1719_p12 }
  0x26   : > { %456 = vmatprep.subr.mxu0 %v389_v23  ;;  %1491 = vmatprep.subr.mxu1 %v1779_v0  ;;  %v1335_v6 = vld [vmem:[%s2368_s3 + $0x138] sm:$0xff]  ;;  %v1350_v7 = vld [vmem:[%s2368_s3 + $0x1a0] sm:$0xff]  ;;  %v1334_v8 = vld [vmem:[%s2368_s3 + $0x130] sm:$0xff] }
  0x27   : > { %457 = vmatpush1.msra.mxu0 %v388_v24  ;;  %1492 = vmatpush3.msra.mxu1 %v1311_v39  ;;  %v1349_v9 = vld [vmem:[%s2368_s3 + $0x198] sm:$0xff]  ;;  %v1333_v10 = vld [vmem:[%s2368_s3 + $0x128] sm:$0xff]  ;;  %v1348_v11 = vld [vmem:[%s2368_s3 + $0x190] sm:$0xff] }
  0x28   : > { %458 = vmatprep.subr.mxu0 %v387_v25  ;;  %1493 = vmatprep.subr.mxu1 %v1779_v0  ;;  %v1332_v12 = vld [vmem:[%s2368_s3 + $0x120] sm:$0xff]  ;;  %v1347_v13 = vld [vmem:[%s2368_s3 + $0x188] sm:$0xff]  ;;  %v1331_v14 = vld [vmem:[%s2368_s3 + $0x118] sm:$0xff] }
  0x29   : > { %459 = vmatpush1.msra.mxu0 %v386_v26  ;;  %1494 = vmatpush3.msra.mxu1 %v1310_v41  ;;  %v1346_v15 = vld [vmem:[%s2368_s3 + $0x180] sm:$0xff]  ;;  %v1330_v16 = vld [vmem:[%s2368_s3 + $0x110] sm:$0xff]  ;;  %v1345_v17 = vld [vmem:[%s2368_s3 + $0x178] sm:$0xff] }
  0x2a   : > { %1304 = vmatmul.mubr.msk.f32.vlgmr.msra.gmra.mxu0 %vm414_vm2, %v384_v27  ;;  %1506 = vmatprep.subr.mxu0 %v1779_v0  ;;  %v1329_v18 = vld [vmem:[%s2368_s3 + $0x108] sm:$0xff]  ;;  %v1344_v19 = vld [vmem:[%s2368_s3 + $0x170] sm:$0xff]  ;;  %v1328_v20 = vld [vmem:[%s2368_s3 + $0x100] sm:$0xff] }
  0x2b   : > { %497 = vmatprep.mubr.f32.mxu0 %v1779_v0  ;;  %1507 = vmatpush3.msk.msra.mxu0 %vm546_vm0, %v525_v28  ;;  %v1343_v21 = vld [vmem:[%s2368_s3 + $0x168] sm:$0xff]  ;;  %v1327_v22 = vld [vmem:[%s2368_s3 + $0xf8] sm:$0xff]  ;;  %v1342_v23 = vld [vmem:[%s2368_s3 + $0x160] sm:$0xff] }
  0x2c   : > { %1508 = vmatprep.subr.mxu0 %v1779_v0  ;;  %1495 = vmatprep.subr.mxu1 %v1779_v0  ;;  %v1326_v24 = vld [vmem:[%s2368_s3 + $0xf0] sm:$0xff]  ;;  %v1341_v25 = vld [vmem:[%s2368_s3 + $0x158] sm:$0xff]  ;;  %v1325_v26 = vld [vmem:[%s2368_s3 + $0xe8] sm:$0xff] }
  0x2d   : > { %1509 = vmatpush3.msra.mxu0 %v524_v29  ;;  %1496 = vmatpush3.msra.mxu1 %v1309_v43  ;;  %v1340_v27 = vld [vmem:[%s2368_s3 + $0x150] sm:$0xff]  ;;  %v1324_v29 = vld [vmem:[%s2368_s3 + $0xe0] sm:$0xff]  ;;  %v1363_v37 = vld [vmem:[%s2368_s3 + $0x1f8] sm:$0xff] }
  0x2e   : > { %1305 = vmatmul.mubr.msk.f32.gmra.mxu0 %vm414_vm2, %v385_v30  ;;  %1510 = vmatprep.subr.mxu0 %v1779_v0  ;;  %v1361_v39 = vld [vmem:[%s2368_s3 + $0x1e8] sm:$0xff]  ;;  %v1359_v41 = vld [vmem:[%s2368_s3 + $0x1d8] sm:$0xff] }
  0x2f   : > { %1511 = vmatpush3.msra.mxu0 %v523_v31  ;;  %1497 = vmatprep.subr.mxu1 %v1779_v0  ;;  %v1369_v31 = vld [vmem:[%s2368_s3 + $0x228] sm:$0x1] }
  0x30   : > { %1512 = vmatprep.subr.mxu0 %v1779_v0  ;;  %1498 = vmatpush3.msra.mxu1 %v1308_v45  ;;  %v1357_v43 = vld [vmem:[%s2368_s3 + $0x1c8] sm:$0xff] }
  0x31   : > { %1513 = vmatpush3.msra.mxu0 %v522_v32  ;;  %1499 = vmatprep.subr.mxu1 %v1779_v0  ;;  %v1368_v32 = vld [vmem:[%s2368_s3 + $0x220] sm:$0xff] }
  0x32   : > { %1514 = vmatprep.subr.mxu0 %v1779_v0  ;;  %1500 = vmatpush3.msra.mxu1 %v1307_v47  ;;  %v982_v47 = vld [vmem:[%s2370_s5 + $0x18] sm:$0xff] }
  0x33   : > { %1515 = vmatpush3.msra.mxu0 %v521_v33  ;;  %1501 = vmatprep.subr.mxu1 %v1779_v0  ;;  %v1367_v33 = vld [vmem:[%s2368_s3 + $0x218] sm:$0xff] }
  0x34   : > { %1516 = vmatprep.subr.mxu0 %v1779_v0  ;;  %1534 = vmatprep.mubr.msk.f32.mxu0 %vm1781_vm3, %v1779_v0 }
  0x35   : > { %1517 = vmatpush3.msra.mxu0 %v520_v34  ;;  %1502 = vmatpush3.msra.mxu1 %v1306_v49  ;;  %v1366_v34 = vld [vmem:[%s2368_s3 + $0x210] sm:$0xff] }
  0x36   : > { %1518 = vmatprep.subr.mxu0 %v1779_v0  ;;  %1537 = vmatprep.subr.mxu1 %v1779_v0 }
  0x37   : > { %1519 = vmatpush3.msra.mxu0 %v519_v35  ;;  %v1365_v35 = vld [vmem:[%s2368_s3 + $0x208] sm:$0xff] }
  0x38   : > { %1520 = vmatprep.subr.mxu0 %v1779_v0 }
  0x39   : > { %1521 = vmatpush3.msra.mxu0 %v518_v36  ;;  %v1364_v36 = vld [vmem:[%s2368_s3 + $0x200] sm:$0xff] }
  0x3a   : > { %1522 = vmatprep.subr.mxu0 %v1779_v0 }
  0x3b   : > { %1523 = vmatpush3.msra.mxu0 %v517_v38  ;;  %v1362_v38 = vld [vmem:[%s2368_s3 + $0x1f0] sm:$0xff] }
  0x3c   : > { %1524 = vmatprep.subr.mxu0 %v1779_v0 }
  0x3d   : > { %1525 = vmatpush3.msra.mxu0 %v516_v40  ;;  %v1360_v40 = vld [vmem:[%s2368_s3 + $0x1e0] sm:$0xff] }
  0x3e   : > { %1526 = vmatprep.subr.mxu0 %v1779_v0 }
  0x3f   : > { %1527 = vmatpush3.msra.mxu0 %v515_v42  ;;  %v1358_v42 = vld [vmem:[%s2368_s3 + $0x1d0] sm:$0xff] }
  0x40   : > { %1528 = vmatprep.subr.mxu0 %v1779_v0 }
  0x41   : > { %1529 = vmatpush3.msra.mxu0 %v514_v44  ;;  %v1356_v44 = vld [vmem:[%s2368_s3 + $0x1c0] sm:$0xff] }
  0x42   : > { %1530 = vmatprep.subr.mxu0 %v1779_v0 }
  0x43   : > { %1531 = vmatpush3.msra.mxu0 %v513_v46  ;;  %v983_v46 = vld [vmem:[%s2370_s5 + $0x20] sm:$0xf] }
  0x44   : > { %1532 = vmatprep.subr.mxu0 %v1779_v0 }
  0x45   : > { %1533 = vmatpush3.msra.mxu0 %v512_v48 }
  0x46   : > { %1568 = vmatprep.subr.mxu0 %v1779_v0 }
  0x91   : > { %v407_v50 = vpop.permute.xlu0 %406 }
  0x95   : > { %v412_v54 = vpop.permute.xlu0 %411 }
  0xea   : > { %v494_v51 = vpop.f32.mrf.mxu0 }
  0xeb   : > { %v495_v53 = vadd.f32 %v494_v51, %v407_v50 }
  0xec   : > { %v496_v52 = vpop.f32.mrf.mxu0 }
  0xed   : > { %v506_v58 = vrot.slane %v495_v53, 5 }
  0xee   : > { %v499_v55 = vpop.f32.mrf.mxu0 }
  0xef   : > { %v500_v56 = vadd.f32 %v499_v55, %v412_v54 }
  0xf0   : > { %v501_v57 = vpop.f32.mrf.mxu0 }
  0xf1   : > { %v507_v59 = vrot.slane %v500_v56, 5  ;;  %v981_v56 = vld [vmem:[%s2370_s5 + $0x10] sm:$0xff]  ;;  %v980_v57 = vld [vmem:[%s2370_s5 + $0x8] sm:$0xff] }
  0xf3   : > { %v508_v60 = vsel %vm505_vm4, %v506_v58, %v507_v59  ;;  %v979_v59 = vld [vmem:[%s2370_s5] sm:$0xff] }
  0xf4   : > { %v510_v61 = vmax.f32 %v495_v53, %v508_v60 }
  0xf6   : > { %v2051_v62 = vmax.f32 %v510_v61, 0.0 }
  0xf8   : > { %1535 = vmatmul.mubr.msk.f32.vlgmr.msra.gmra.mxu0 %vm543_vm5, %v2051_v62  ;;  %v542_v1 = vrot.slane %v2051_v62, 1  ;;  %v802_v28 = vrot.slane %v2051_v62, 3  ;;  %v710_v30 = vrot.slane %v2051_v62, 2  ;;  %v894_v45 = vrot.slane %v2051_v62, 4 }
  0xf9   : > { %1569 = vmatpush3.msk.msra.mxu0 %vm546_vm0, %v1353_v63  ;;  %1596 = vmatprep.mubr.msk.f32.mxu0 %vm1781_vm3, %v1779_v0 }
  0xfa   : > { %1570 = vmatprep.subr.mxu0 %v1779_v0  ;;  %1504 = vmatmul.mubr.msk.f32.vlgmr.msra.gmra.mxu1 %vm543_vm5, %v542_v1 }
  0xfb   : > { %1538 = vmatpush3.msk.msra.mxu1 %vm546_vm0, %v1337_v2  ;;  %1571 = vmatpush3.msra.mxu0 %v1352_v3  ;;  %v976_v2 = vld [vmem:[%s2369_s4] sm:$0x1] }
  0xfc   : > { %1539 = vmatprep.subr.mxu1 %v1779_v0  ;;  %1572 = vmatprep.subr.mxu0 %v1779_v0 }
  0xfd   : > { %1540 = vmatpush3.msra.mxu1 %v1336_v4  ;;  %1573 = vmatpush3.msra.mxu0 %v1351_v5 }
  0xfe   : > { %1541 = vmatprep.subr.mxu1 %v1779_v0  ;;  %1574 = vmatprep.subr.mxu0 %v1779_v0 }
  0xff   : > { %1542 = vmatpush3.msra.mxu1 %v1335_v6  ;;  %1575 = vmatpush3.msra.mxu0 %v1350_v7  ;;  %v1070_v7 = vld [vmem:[%s2372_s7 + $0x38] sm:$0xff] }
 0x100   : > { %1543 = vmatprep.subr.mxu1 %v1779_v0  ;;  %1576 = vmatprep.subr.mxu0 %v1779_v0 }
 0x101   : > { %1544 = vmatpush3.msra.mxu1 %v1334_v8  ;;  %1577 = vmatpush3.msra.mxu0 %v1349_v9  ;;  %v1069_v8 = vld [vmem:[%s2372_s7 + $0x30] sm:$0xff]  ;;  %v1068_v9 = vld [vmem:[%s2372_s7 + $0x28] sm:$0xff] }
 0x102   : > { %1545 = vmatprep.subr.mxu1 %v1779_v0  ;;  %1578 = vmatprep.subr.mxu0 %v1779_v0 }
 0x103   : > { %1546 = vmatpush3.msra.mxu1 %v1333_v10  ;;  %1579 = vmatpush3.msra.mxu0 %v1348_v11  ;;  %v1067_v10 = vld [vmem:[%s2372_s7 + $0x20] sm:$0xff]  ;;  %v1066_v11 = vld [vmem:[%s2372_s7 + $0x18] sm:$0xff] }
 0x104   : > { %1547 = vmatprep.subr.mxu1 %v1779_v0  ;;  %1580 = vmatprep.subr.mxu0 %v1779_v0 }
 0x105   : > { %1548 = vmatpush3.msra.mxu1 %v1332_v12  ;;  %1581 = vmatpush3.msra.mxu0 %v1347_v13  ;;  %v1065_v12 = vld [vmem:[%s2372_s7 + $0x10] sm:$0xff]  ;;  %v1064_v13 = vld [vmem:[%s2372_s7 + $0x8] sm:$0xff] }
 0x106   : > { %1549 = vmatprep.subr.mxu1 %v1779_v0  ;;  %1582 = vmatprep.subr.mxu0 %v1779_v0 }
 0x107   : > { %1550 = vmatpush3.msra.mxu1 %v1331_v14  ;;  %1583 = vmatpush3.msra.mxu0 %v1346_v15  ;;  %v1063_v14 = vld [vmem:[%s2372_s7] sm:$0xff]  ;;  %v1150_v15 = vld [vmem:[%s2374_s9 + $0x18] sm:$0xff] }
 0x108   : > { %1551 = vmatprep.subr.mxu1 %v1779_v0  ;;  %1584 = vmatprep.subr.mxu0 %v1779_v0 }
 0x109   : > { %1552 = vmatpush3.msra.mxu1 %v1330_v16  ;;  %1585 = vmatpush3.msra.mxu0 %v1345_v17  ;;  %v984_v16 = vld [vmem:[%s2371_s6] sm:$0x1] }
 0x10a   : > { %1553 = vmatprep.subr.mxu1 %v1779_v0  ;;  %1586 = vmatprep.subr.mxu0 %v1779_v0 }
 0x10b   : > { %1554 = vmatpush3.msra.mxu1 %v1329_v18  ;;  %1587 = vmatpush3.msra.mxu0 %v1344_v19 }
 0x10c   : > { %1555 = vmatprep.subr.mxu1 %v1779_v0  ;;  %1588 = vmatprep.subr.mxu0 %v1779_v0 }
 0x10d   : > { %1556 = vmatpush3.msra.mxu1 %v1328_v20  ;;  %1589 = vmatpush3.msra.mxu0 %v1343_v21  ;;  %v1149_v21 = vld [vmem:[%s2374_s9 + $0x10] sm:$0xff] }
 0x10e   : > { %1557 = vmatprep.subr.mxu1 %v1779_v0  ;;  %1590 = vmatprep.subr.mxu0 %v1779_v0 }
 0x10f   : > { %1558 = vmatpush3.msra.mxu1 %v1327_v22  ;;  %1591 = vmatpush3.msra.mxu0 %v1342_v23  ;;  %v1148_v22 = vld [vmem:[%s2374_s9 + $0x8] sm:$0xff]  ;;  %v1147_v23 = vld [vmem:[%s2374_s9] sm:$0xff] }
 0x110   : > { %1559 = vmatprep.subr.mxu1 %v1779_v0  ;;  %1592 = vmatprep.subr.mxu0 %v1779_v0 }
 0x111   : > { %1560 = vmatpush3.msra.mxu1 %v1326_v24  ;;  %1593 = vmatpush3.msra.mxu0 %v1341_v25  ;;  %v1071_v24 = vld [vmem:[%s2373_s8] sm:$0x1] }
 0x112   : > { %1561 = vmatprep.subr.mxu1 %v1779_v0  ;;  %1594 = vmatprep.subr.mxu0 %v1779_v0 }
 0x113   : > { %1562 = vmatpush3.msra.mxu1 %v1325_v26  ;;  %1595 = vmatpush3.msra.mxu0 %v1340_v27 }
 0x114   : > { %1563 = vmatprep.subr.mxu1 %v1779_v0  ;;  %1597 = vmatmul.mubr.msk.f32.vlgmr.msra.gmra.mxu0 %vm543_vm5, %v802_v28 }
 0x115   : > { %1564 = vmatpush3.msra.mxu1 %v1324_v29  ;;  %1565 = vmatprep.mubr.msk.f32.mxu1 %vm1781_vm3, %v1779_v0 }
 0x116   : > { %1566 = vmatmul.mubr.msk.f32.vlgmr.msra.gmra.mxu1 %vm543_vm5, %v710_v30  ;;  %1599 = vmatprep.subr.mxu1 %v1779_v0 }
 0x117   : > { %1600 = vmatpush3.msk.msra.mxu1 %vm546_vm0, %v1369_v31  ;;  %1627 = vmatprep.mubr.msk.f32.mxu1 %vm1781_vm3, %v1779_v0 }
 0x118   : > { %1601 = vmatprep.subr.mxu1 %v1779_v0  ;;  %1630 = vmatprep.subr.mxu0 %v1779_v0 }
 0x119   : > { %1602 = vmatpush3.msra.mxu1 %v1368_v32  ;;  %1640 = vmatprep.mubr.msk.f32.mxu0 %vm1781_vm3, %v1779_v0 }
 0x11a   : > { %1603 = vmatprep.subr.mxu1 %v1779_v0  ;;  %1631 = vmatpush3.msk.msra.mxu0 %vm421_vm1, %v983_v46 }
 0x11b   : > { %1604 = vmatpush3.msra.mxu1 %v1367_v33  ;;  %1632 = vmatprep.subr.mxu0 %v1779_v0 }
 0x11c   : > { %1605 = vmatprep.subr.mxu1 %v1779_v0  ;;  %1633 = vmatpush3.msra.mxu0 %v982_v47 }
 0x11d   : > { %1606 = vmatpush3.msra.mxu1 %v1366_v34  ;;  %1634 = vmatprep.subr.mxu0 %v1779_v0 }
 0x11e   : > { %1607 = vmatprep.subr.mxu1 %v1779_v0  ;;  %1635 = vmatpush3.msra.mxu0 %v981_v56 }
 0x11f   : > { %1608 = vmatpush3.msra.mxu1 %v1365_v35  ;;  %1636 = vmatprep.subr.mxu0 %v1779_v0 }
 0x120   : > { %1609 = vmatprep.subr.mxu1 %v1779_v0  ;;  %1637 = vmatpush3.msra.mxu0 %v980_v57 }
 0x121   : > { %1610 = vmatpush3.msra.mxu1 %v1364_v36  ;;  %1638 = vmatprep.subr.mxu0 %v1779_v0 }
 0x122   : > { %1611 = vmatprep.subr.mxu1 %v1779_v0  ;;  %1639 = vmatpush3.msra.mxu0 %v979_v59 }
 0x123   : > { %1612 = vmatpush3.msra.mxu1 %v1363_v37  ;;  %1643 = vmatprep.subr.mxu0 %v1779_v0 }
 0x124   : > { %1613 = vmatprep.subr.mxu1 %v1779_v0 }
 0x125   : > { %1614 = vmatpush3.msra.mxu1 %v1362_v38 }
 0x126   : > { %1615 = vmatprep.subr.mxu1 %v1779_v0 }
 0x127   : > { %1616 = vmatpush3.msra.mxu1 %v1361_v39 }
 0x128   : > { %1617 = vmatprep.subr.mxu1 %v1779_v0 }
 0x129   : > { %1618 = vmatpush3.msra.mxu1 %v1360_v40 }
 0x12a   : > { %1619 = vmatprep.subr.mxu1 %v1779_v0 }
 0x12b   : > { %1620 = vmatpush3.msra.mxu1 %v1359_v41 }
 0x12c   : > { %1621 = vmatprep.subr.mxu1 %v1779_v0 }
 0x12d   : > { %1622 = vmatpush3.msra.mxu1 %v1358_v42 }
 0x12e   : > { %1623 = vmatprep.subr.mxu1 %v1779_v0 }
 0x12f   : > { %1624 = vmatpush3.msra.mxu1 %v1357_v43 }
 0x130   : > { %1625 = vmatprep.subr.mxu1 %v1779_v0 }
 0x131   : > { %1626 = vmatpush3.msra.mxu1 %v1356_v44 }
 0x132   : > { %1628 = vmatmul.mubr.msk.f32.vlgmr.msra.gmra.mxu1 %vm543_vm5, %v894_v45  ;;  %1662 = vmatprep.subr.mxu1 %v1779_v0 }
 0x133   : > { %1670 = vmatprep.mubr.msk.f32.mxu1 %vm1781_vm3, %v1779_v0  ;;  %1663 = vmatpush3.msra.mxu1 %v1150_v15 }
 0x134   : > { %1664 = vmatprep.subr.mxu1 %v1779_v0 }
 0x135   : > { %1665 = vmatpush3.msra.mxu1 %v1149_v21 }
 0x136   : > { %1666 = vmatprep.subr.mxu1 %v1779_v0 }
 0x137   : > { %1667 = vmatpush3.msra.mxu1 %v1148_v22 }
 0x138   : > { %1668 = vmatprep.subr.mxu1 %v1779_v0 }
 0x139   : > { %1669 = vmatpush3.msra.mxu1 %v1147_v23 }
 0x1b8   : > { %v691_v48 = vpop.f32.mrf.mxu0 }
 0x1ba   : > { %v616_v49 = vpop.f32.mrf.mxu1  ;;  %v1536_v50 = vpop.f32.mrf.mxu0 }
 0x1bb   : > { %v692_v58 = vadd.f32 %v691_v48, %v616_v49 }
 0x1bc   : > { %v1505_v51 = vpop.f32.mrf.mxu1 }
 0x1d4   : > { %v874_v52 = vpop.f32.mrf.mxu0 }
 0x1d6   : > { %v782_v53 = vpop.f32.mrf.mxu1  ;;  %v1598_v54 = vpop.f32.mrf.mxu0 }
 0x1d7   : > { %v786_v60 = vadd.f32 %v782_v53, %v692_v58 }
 0x1d8   : > { %v1567_v55 = vpop.f32.mrf.mxu1 }
 0x1d9   : > { %v878_v61 = vadd.f32 %v874_v52, %v786_v60 }
 0x1f2   : > { %v966_v62 = vpop.f32.mrf.mxu1 }
 0x1f3   : > { %v970_v63 = vadd.f32 %v966_v62, %v878_v61 }
 0x1f4   : > { %v1629_v1 = vpop.f32.mrf.mxu1 }
 0x1f5   : > { %972 = vrot.lane.b32.xlu1 %v970_v63, %s1782_s25  ;;  %s1723_s25 = scalar_lea.vmem %s1722_s24, 32 }
 0x1f6   : > { %p1725_p1 = scmp.lt.s32.totalorder %s1723_s25, %s1717_s22 }
 0x1f8   : > { %p1726_p2 = por %p1725_p1, %p1724_p0 }
 0x1fa   : > { %p1727_p3 = pnand %p1726_p2, %p1720_p13 }
 0x267   : > { %v973_v3 = vpop.permute.xlu1 %972 }
 0x268   : > { %v975_v4 = vmax.f32 %v970_v63, %v973_v3 }
 0x26a   : > { %v977_v5 = vadd.f32 %v976_v2, %v975_v4 }
 0x26c   : > { %v978_v6 = vmax.f32 %v977_v5, 0.0 }
 0x26e   : > { %1641 = vmatmul.mubr.msk.f32.vlgmr.msra.gmra.mxu0 %vm985_vm6, %v978_v6 }
 0x26f   : > { %1644 = vmatpush3.msra.mxu0 %v1070_v7  ;;  %1659 = vmatprep.mubr.msk.f32.mxu0 %vm1781_vm3, %v1779_v0 }
 0x270   : > { %1645 = vmatprep.subr.mxu0 %v1779_v0 }
 0x271   : > { %1646 = vmatpush3.msra.mxu0 %v1069_v8 }
 0x272   : > { %1647 = vmatprep.subr.mxu0 %v1779_v0 }
 0x273   : > { %1648 = vmatpush3.msra.mxu0 %v1068_v9 }
 0x274   : > { %1649 = vmatprep.subr.mxu0 %v1779_v0 }
 0x275   : > { %1650 = vmatpush3.msra.mxu0 %v1067_v10 }
 0x276   : > { %1651 = vmatprep.subr.mxu0 %v1779_v0 }
 0x277   : > { %1652 = vmatpush3.msra.mxu0 %v1066_v11 }
 0x278   : > { %1653 = vmatprep.subr.mxu0 %v1779_v0 }
 0x279   : > { %1654 = vmatpush3.msra.mxu0 %v1065_v12 }
 0x27a   : > { %1655 = vmatprep.subr.mxu0 %v1779_v0 }
 0x27b   : > { %1656 = vmatpush3.msra.mxu0 %v1064_v13 }
 0x27c   : > { %1657 = vmatprep.subr.mxu0 %v1779_v0  ;;  %v1151_v0 = vld [vmem:[%s2375_s10] sm:$0x1] }
 0x27d   : > { %1658 = vmatpush3.msra.mxu0 %v1063_v14 }
 0x32e   : > { %v1058_v17 = vpop.f32.mrf.mxu0 }
 0x32f   : > { %v1059_v18 = vadd.f32 %v1058_v17, %v984_v16 }
 0x330   : > { %v1642_v19 = vpop.f32.mrf.mxu0 }
 0x331   : > { %v1062_v20 = vmax.f32 %v1059_v18, 0.0 }
 0x333   : > { %1660 = vmatmul.mubr.msk.f32.vlgmr.msra.gmra.mxu0 %vm1072_vm7, %v1062_v20 }
 0x3f3   : > { %v1142_v25 = vpop.f32.mrf.mxu0 }
 0x3f4   : > { %v1143_v26 = vadd.f32 %v1142_v25, %v1071_v24 }
 0x3f5   : > { %v1661_v27 = vpop.f32.mrf.mxu0 }
 0x3f6   : > { %v1146_v28 = vmax.f32 %v1143_v26, 0.0 }
 0x3f8   : > { %1671 = vmatmul.mubr.msk.f32.vlgmr.msra.gmra.mxu1 %vm1152_vm8, %v1146_v28 }
 0x4b8   : > { %v1222_v29 = vpop.f32.mrf.mxu1 }
 0x4b9   : > { %v1223_v30 = vadd.f32 %v1222_v29, %v1151_v0 }
 0x4ba   : > { %v1672_v31 = vpop.f32.mrf.mxu1 }
 0x4bb   : > { %1227 = vst.msk [vmem:[%s378_s30] sm:$0x1] %vm1226_vm9, %v1223_v30 }
 0x4bc   : > { %1730 = shalt.err (!%p1727_p3)
}
 0x4bd   : > { %s1731_s29 = scalar_lea.hbm %s2330_s15, 16  ;;  %s1735_s14 = scalar_lea.hbm %s2376_s11, 32 }
 0x4be   : > { %p1732_p4 = scmp.ne.s32.totalorder %s2330_s15, %s1731_s29  ;;  %p1736_p9 = scmp.lt.s32.totalorder %s2330_s15, %s2376_s11 }
 0x4bf   : > { %p1737_p10 = scmp.lt.s32.totalorder %s1735_s14, %s1731_s29 }
 0x4c0   : > { %p1733_p7 = pnand %p1732_p4, %p1882_p5 }
 0x4c1   : > { %p1738_p11 = por %p1737_p10, %p1736_p9 }
 0x4c2   : > { %p1734_p8 = pneg %p1733_p7 }
 0x4c4   : > { %p1739_p12 = pnand %p1738_p11, %p1734_p8 }
 0x4c6   : > { %1742 = shalt.err (!%p1739_p12)
}
 0x4c7   : > { %1673 = dma.vmem_to_hbm [thread:$0]  (%p1882_p5), %s1242_s13, 16, %s2330_s15, %s1229_s16  }
 0x4c8 PF: > { %p1679_p13 = scmp.ge.s32.totalorder %s1777_s20, 2  ;;  %s1253_s22 = sand.u32 1, %s1765_s17  }
 0x4c9   : > { %s1254_s24 = scalar_lea.sflag [#allocation3], %s1253_s22 }
 0x4ca   : > { %p1676_p0 = pnand %p1679_p13, %p1886_p6 }
 0x4cc   : > { %p1677_p1 = pneg %p1676_p0 }
 0x4ce   : > { %1760 = dma.done.wait (%p1677_p1), %s1254_s24, 16  }
 0x4cf   : > { %1762 = vsyncadd (%p1677_p1), %s1254_s24, 4294967280  ;;  %s2380_s25 = sld [smem:[#allocation5_spill]]  ;;  %p21_p2 = scmp.ge.s32.totalorder %s1869_s23, 4  }
 0x4d0   : > { %s2381_s17 = smov %s1769_s18  ;;  %s2382_s18 = smov %s1773_s19 }
 0x4d1   : > { %s2384_s20 = smov %s1869_s23  ;;  %23 = sbr.rel (!%p21_p2) target bundleno = 3 (0x3), region = 103 }
 0x4d5   : > { %s2383_s19 = smov %s2380_s25 }
 0x4d6   :  { %1258 = vsyncpa [#allocation3], 1 }
 0x4d7   :  { %1260 = vsyncpa [#allocation3 + $0x1], 1 }

</bundles_post_ra>
